<compile_context>
chip_gen: v7x
topology: tpu7x:2x2x1
jax: 0.10.0
libtpu: 0.0.40
codegen_flags: <defaults>
</compile_context>

<pallas_src>
import functools

import jax
import jax.numpy as jnp
from jax import lax
from jax.experimental import pallas as pl
from jax.experimental.pallas import tpu as pltpu


def _round_up(v, m):
    return ((v + m - 1) // m) * m


# Conservative per-block caps that fit every generation's scoped VMEM
# (v5e 16 MiB default / v6e 32 MiB / v7x 32 MiB scoped of 64 MiB physical)
# with double buffering. v5e/v6e could push tm to 1024; 512 is safe on v7x.
_TM_MAX = 512      # rows per block
_TN_MAX = 512      # output columns per block
_TK_MAX = 1024     # reduction (Din) slab per K step


# ---------------------------------------------------------------------------
# Portable counter-based PRNG (int32 only: works on TPU *and* in interpret
# mode, unlike pltpu.prng_seed). Wang-style avalanche hash of (row, col, seed).
# ---------------------------------------------------------------------------
def _keep_mask(rows, cols, seed, p):
    z = (rows * jnp.int32(1013904223)
         + cols * jnp.int32(1664525)
         + seed * jnp.int32(668265263)
         + jnp.int32(374761393))
    for _ in range(2):
        z = (lax.shift_right_logical(z, jnp.int32(16)) ^ z) * jnp.int32(73244475)
    z = lax.shift_right_logical(z, jnp.int32(16)) ^ z
    bits = z & jnp.int32(0x7FFFFFFF)                       # 31 uniform bits
    u = bits.astype(jnp.float32) * jnp.float32(1.0 / 2147483648.0)
    return u >= jnp.float32(p)                             # P(keep) = 1 - p


# ---------------------------------------------------------------------------
# Kernel: one (tm, tn) output tile, accumulated over K steps, fused epilogue.
# ---------------------------------------------------------------------------
def _linear_relu_dropout_kernel(seed_ref, x_ref, w_ref, b_ref, o_ref, acc_ref,
                                *, p, training, single_k_step):
    k = pl.program_id(2)
    apply_dropout = bool(training) and p > 0.0

    def draw_keep_mask():
        tm, tn = acc_ref.shape
        rows = lax.broadcasted_iota(jnp.int32, (tm, tn), 0) + pl.program_id(0) * tm
        cols = lax.broadcasted_iota(jnp.int32, (tm, tn), 1) + pl.program_id(1) * tn
        return _keep_mask(rows, cols, seed_ref[0], p)

    # Single-K-step case: generate the dropout bits before the matmul — they
    # are independent of it, so the VPU hash work overlaps the MXU.
    keep = draw_keep_mask() if (apply_dropout and single_k_step) else None

    @pl.when(k == 0)
    def _init():
        acc_ref[...] = jnp.zeros_like(acc_ref)

    acc_ref[...] += jnp.dot(x_ref[...], w_ref[...],
                            preferred_element_type=jnp.float32)

    @pl.when(k == pl.num_programs(2) - 1)
    def _epilogue():
        y = acc_ref[...] + b_ref[...].astype(jnp.float32)
        y = jnp.maximum(y, 0.0)                            # ReLU (f32 epilogue)
        if apply_dropout:
            if p >= 1.0:
                y = jnp.zeros_like(y)
            else:
                km = keep if keep is not None else draw_keep_mask()
                y = jnp.where(km, y * jnp.float32(1.0 / (1.0 - p)),
                              jnp.float32(0.0))
        o_ref[...] = y.astype(o_ref.dtype)


# ---------------------------------------------------------------------------
# Parameter prep (hoisted out of the per-call path): transpose + pad weight,
# pad bias, pick K/N tile sizes. Do this once at module init.
# ---------------------------------------------------------------------------
def prepare_linear_block_params(weight, bias, *, matmul_dtype=None):
    dout, din = weight.shape
    din_p = _round_up(din, 128)            # lanes
    dout_p = _round_up(dout, 128)          # lanes
    tk = min(din_p, _TK_MAX)
    tn = min(dout_p, _TN_MAX)
    din_p = _round_up(din_p, tk)
    dout_p = _round_up(dout_p, tn)
    w_t = jnp.pad(weight.T, ((0, din_p - din), (0, dout_p - dout)))
    if matmul_dtype is not None:
        w_t = w_t.astype(matmul_dtype)
    b_p = jnp.pad(bias, (0, dout_p - dout)).reshape(1, dout_p)
    return dict(w_t=w_t, b_p=b_p, din=din, dout=dout, tk=tk, tn=tn,
                matmul_dtype=matmul_dtype)


def linear_block_apply(x, params, *, p=0.5, training=True, seed=0):
    """y = dropout(relu(x @ W^T + b)) — matches nn.Linear + ReLU + Dropout."""
    w_t, b_p = params["w_t"], params["b_p"]
    din, dout = params["din"], params["dout"]
    tk, tn = params["tk"], params["tn"]
    matmul_dtype = params["matmul_dtype"]
    din_p, dout_p = w_t.shape

    orig_shape = x.shape
    assert orig_shape[-1] == din
    x2 = x.reshape(-1, din)
    m = x2.shape[0]

    m_p = _round_up(m, 8)                  # sublanes
    tm = m_p if m_p <= _TM_MAX else _TM_MAX
    m_p = _round_up(m_p, tm)

    x_dtype = matmul_dtype if matmul_dtype is not None else x.dtype
    x_p = jnp.pad(x2, ((0, m_p - m), (0, din_p - din))).astype(x_dtype)

    nm, nn, nk = m_p // tm, dout_p // tn, din_p // tk
    seed_arr = jnp.asarray([seed], dtype=jnp.int32)

    kernel = functools.partial(
        _linear_relu_dropout_kernel,
        p=float(p), training=bool(training), single_k_step=(nk == 1))

    in_itemsize = jnp.dtype(x_dtype).itemsize
    out_itemsize = jnp.dtype(x.dtype).itemsize
    # VMEM estimate: double-buffered inputs/output + single f32 accumulator.
    est_vmem = (2 * (tm * tk + tk * tn + tn) * in_itemsize
                + 2 * tm * tn * out_itemsize
                + tm * tn * 4)
    vmem_limit = int(min(max(2 * est_vmem, 32 * 1024 * 1024), 64 * 1024 * 1024))

    cost = pl.CostEstimate(
        flops=2 * m_p * din_p * dout_p,
        transcendentals=0,
        bytes_accessed=(m_p * din_p + din_p * dout_p + dout_p) * in_itemsize
                       + m_p * dout_p * out_itemsize)

    out_p = pl.pallas_call(
        kernel,
        out_shape=jax.ShapeDtypeStruct((m_p, dout_p), x.dtype),
        grid_spec=pltpu.PrefetchScalarGridSpec(
            num_scalar_prefetch=1,
            grid=(nm, nn, nk),
            in_specs=[
                pl.BlockSpec((tm, tk), lambda i, j, k, s: (i, k)),
                pl.BlockSpec((tk, tn), lambda i, j, k, s: (k, j)),
                pl.BlockSpec((1, tn), lambda i, j, k, s: (0, j)),
            ],
            out_specs=pl.BlockSpec((tm, tn), lambda i, j, k, s: (i, j)),
            scratch_shapes=[pltpu.VMEM((tm, tn), jnp.float32)],
        ),
        compiler_params=pltpu.CompilerParams(
            dimension_semantics=("parallel", "parallel", "arbitrary"),
            vmem_limit_bytes=vmem_limit),
        cost_estimate=cost,
    )(seed_arr, x_p, w_t, b_p)

    out = out_p[:m, :dout]
    return out.reshape(orig_shape[:-1] + (dout,))


def linear_block(x, weight, bias, *, p=0.5, training=True, seed=0,
                 matmul_dtype=None):
    """Convenience one-shot wrapper (prep + apply). Prefer preparing once."""
    params = prepare_linear_block_params(weight, bias, matmul_dtype=matmul_dtype)
    return linear_block_apply(x, params, p=p, training=training, seed=seed)


if __name__ == "__main__":
    # Small shapes consistent with LinearBlock(in_channels=32, out_channels=64)
    B, S, DIN, DOUT = 2, 8, 32, 64
    P = 0.5

    key = jax.random.PRNGKey(0)
    kx, kw, kb = jax.random.split(key, 3)
    x = jax.random.normal(kx, (B, S, DIN), dtype=jnp.float32)
    bound = 1.0 / (DIN ** 0.5)
    weight = jax.random.uniform(kw, (DOUT, DIN),
                                minval=-bound, maxval=bound, dtype=jnp.float32)
    bias = jax.random.uniform(kb, (DOUT,),
                              minval=-bound, maxval=bound, dtype=jnp.float32)

    # Hoist the static weight transpose/pad out of the per-call path.
    params = prepare_linear_block_params(weight, bias)

    # Eval mode (dropout = identity): exact check vs pure-JAX reference.
    out_eval = jax.block_until_ready(
        linear_block_apply(x, params, p=P, training=False))
    ref = jnp.maximum(jnp.einsum("bsd,od->bso", x, weight) + bias, 0.0)
    assert out_eval.shape == (B, S, DOUT)
    assert jnp.allclose(out_eval, ref, atol=1e-5, rtol=1e-5)

    # Training mode: each element is either dropped (0) or equals ref/(1-p).
    out_tr = jax.block_until_ready(
        linear_block_apply(x, params, p=P, training=True, seed=123))
    scaled = ref / (1.0 - P)
    ok = (jnp.abs(out_tr) < 1e-6) | (jnp.abs(out_tr - scaled) < 1e-4)
    assert out_tr.shape == (B, S, DOUT)
    assert bool(jnp.all(ok))

    # The dropout mask should actually keep some and drop some active units.
    active = ref > 1e-3
    kept = int(jnp.sum((jnp.abs(out_tr - scaled) < 1e-4) & active))
    dropped = int(jnp.sum((jnp.abs(out_tr) < 1e-6) & active))
    assert kept > 0 and dropped > 0

    print("KERNEL_OK")
</pallas_src>

<mosaic_0001>
module attributes {stable_mosaic.version = 11 : i64} {
  func.func @_linear_relu_dropout_kernel(%arg0: i32, %arg1: i32, %arg2: i32, %arg3: memref<1xi32, #tpu.memory_space<smem>>, %arg4: memref<16x128xf32, #tpu.memory_space<vmem>>, %arg5: memref<128x128xf32, #tpu.memory_space<vmem>>, %arg6: memref<1x128xf32, #tpu.memory_space<vmem>>, %arg7: memref<16x128xf32, #tpu.memory_space<vmem>>, %arg8: memref<16x128xf32, #tpu.memory_space<vmem>>) attributes {dimension_semantics = [#tpu.dimension_semantics<parallel>, #tpu.dimension_semantics<parallel>, #tpu.dimension_semantics<arbitrary>], iteration_bounds = array<i64: 1, 1, 1>, scalar_prefetch = 1 : i64, scratch_operands = 1 : i64, tpu.core_type = #tpu.core_type<tc>, window_params = [{transform_indices = @transform_0, window_bounds = array<i64: 16, 128>}, {transform_indices = @transform_1, window_bounds = array<i64: 128, 128>}, {transform_indices = @transform_2, window_bounds = array<i64: 1, 128>}, {transform_indices = @transform_3, window_bounds = array<i64: 16, 128>}]} {
    %c0_i32 = arith.constant 0 : i32
    %0 = arith.cmpi eq, %arg2, %c0_i32 : i32
    %1 = arith.extui %0 : i1 to i32
    %c0_i32_0 = arith.constant 0 : i32
    %2 = arith.cmpi ne, %1, %c0_i32_0 : i32
    scf.if %2 {
      %cst_10 = arith.constant 0.000000e+00 : f32
      %12 = vector.broadcast %cst_10 : f32 to vector<16x128xf32>
      %c0_11 = arith.constant 0 : index
      %c0_12 = arith.constant 0 : index
      %13 = vector.load %arg8[%c0_11, %c0_12] : memref<16x128xf32, #tpu.memory_space<vmem>>, vector<16x128xf32>
      tpu.vector_store %arg8[%c0_11, %c0_12], %12 {strides = array<i32>} : memref<16x128xf32, #tpu.memory_space<vmem>>, vector<16x128xf32>,
    } else {
    }
    %c0 = arith.constant 0 : index
    %c0_1 = arith.constant 0 : index
    %3 = vector.load %arg8[%c0, %c0_1] : memref<16x128xf32, #tpu.memory_space<vmem>>, vector<16x128xf32>
    %c0_2 = arith.constant 0 : index
    %c0_3 = arith.constant 0 : index
    %4 = vector.load %arg4[%c0_2, %c0_3] : memref<16x128xf32, #tpu.memory_space<vmem>>, vector<16x128xf32>
    %c0_4 = arith.constant 0 : index
    %c0_5 = arith.constant 0 : index
    %5 = vector.load %arg5[%c0_4, %c0_5] : memref<128x128xf32, #tpu.memory_space<vmem>>, vector<128x128xf32>
    %cst = arith.constant dense<0.000000e+00> : vector<16x128xf32>
    %6 = tpu.matmul %4, %5, %cst {dimension_numbers = #tpu.dot_dimension_numbers<[1], [0], [0], [1], [0, 0, 1, 1], [], []>} : vector<16x128xf32>, vector<128x128xf32>, vector<16x128xf32> -> vector<16x128xf32>
    %7 = arith.addf %3, %6 : vector<16x128xf32>
    %c0_6 = arith.constant 0 : index
    %c0_7 = arith.constant 0 : index
    %8 = vector.load %arg8[%c0_6, %c0_7] : memref<16x128xf32, #tpu.memory_space<vmem>>, vector<16x128xf32>
    tpu.vector_store %arg8[%c0_6, %c0_7], %7 {strides = array<i32>} : memref<16x128xf32, #tpu.memory_space<vmem>>, vector<16x128xf32>,
    %c0_i32_8 = arith.constant 0 : i32
    %9 = arith.cmpi eq, %arg2, %c0_i32_8 : i32
    %10 = arith.extui %9 : i1 to i32
    %c0_i32_9 = arith.constant 0 : i32
    %11 = arith.cmpi ne, %10, %c0_i32_9 : i32
    scf.if %11 {
      %c0_10 = arith.constant 0 : index
      %c0_11 = arith.constant 0 : index
      %12 = vector.load %arg8[%c0_10, %c0_11] : memref<16x128xf32, #tpu.memory_space<vmem>>, vector<16x128xf32>
      %c0_12 = arith.constant 0 : index
      %c0_13 = arith.constant 0 : index
      %13 = vector.load %arg6[%c0_12, %c0_13] : memref<1x128xf32, #tpu.memory_space<vmem>>, vector<1x128xf32>
      %14 = vector.broadcast %13 : vector<1x128xf32> to vector<16x128xf32>
      %15 = arith.addf %12, %14 : vector<16x128xf32>
      %cst_14 = arith.constant 0.000000e+00 : f32
      %16 = vector.broadcast %cst_14 : f32 to vector<16x128xf32>
      %17 = arith.maximumf %15, %16 : vector<16x128xf32>
      %c0_15 = arith.constant 0 : index
      %c0_16 = arith.constant 0 : index
      %18 = vector.load %arg7[%c0_15, %c0_16] : memref<16x128xf32, #tpu.memory_space<vmem>>, vector<16x128xf32>
      tpu.vector_store %arg7[%c0_15, %c0_16], %17 {strides = array<i32>} : memref<16x128xf32, #tpu.memory_space<vmem>>, vector<16x128xf32>,
    } else {
    }
    return
  }
  func.func @transform_0(%arg0: i32, %arg1: i32, %arg2: i32, %arg3: memref<1xi32, #tpu.memory_space<smem>>) -> (i32, i32) {
    %c0_i32 = arith.constant 0 : i32
    return %arg0, %arg2 : i32, i32
  }
  func.func @transform_1(%arg0: i32, %arg1: i32, %arg2: i32, %arg3: memref<1xi32, #tpu.memory_space<smem>>) -> (i32, i32) {
    %c0_i32 = arith.constant 0 : i32
    return %arg2, %arg1 : i32, i32
  }
  func.func @transform_2(%arg0: i32, %arg1: i32, %arg2: i32, %arg3: memref<1xi32, #tpu.memory_space<smem>>) -> (i32, i32) {
    %c0_i32 = arith.constant 0 : i32
    %c0_i32_0 = arith.constant 0 : i32
    return %c0_i32, %arg1 : i32, i32
  }
  func.func @transform_3(%arg0: i32, %arg1: i32, %arg2: i32, %arg3: memref<1xi32, #tpu.memory_space<smem>>) -> (i32, i32) {
    %c0_i32 = arith.constant 0 : i32
    return %arg0, %arg1 : i32, i32
  }
}

</mosaic_0001>

<bundles_post_ra>
// kernel: tpu_custom_call.1
= control target key start
LH: loop header
LB: loop body
LE: loop exit
PB: predicated region body
PF: predicated region fallthrough
CT: control target
= control target key end

     0   :  { %10 = vsyncpa [#allocation6], 0  ;;  %s427_s0 = inlined_call_operand.<no memory space> [shape: s32[1], index: 0, kind: input, shape index: {}]   ;;  %s428_s1 = inlined_call_operand.hbm [shape: f32[16,128], index: 1, kind: input, shape index: {}]   ;;  %s429_s2 = inlined_call_operand.hbm [shape: f32[128,128], index: 2, kind: input, shape index: {}]   ;;  %s430_s3 = inlined_call_operand.vmem [shape: f32[1,128], index: 3, kind: input, shape index: {}]   ;;  %s431_s4 = inlined_call_operand.hbm [shape: f32[16,128], index: 4, kind: output, shape index: {}]  }
   0x1   :  { %11 = vsyncpa [#allocation9], 0 }
   0x2   :  { %12 = vsyncpa [#allocation7], 0  ;;  %s349_s15 = smov [#allocation5]   ;;  %s277_s18 = scalar_lea.hbm %s428_s1, 256 }
   0x3   :  { %s18_s16 = sshll.u32 %s349_s15, 4  ;;  %p278_p0 = scmp.ne.s32.totalorder %s428_s1, %s277_s18  ;;  %s19_s16 = int_to_ptr.vmem [resolvable:$true] %s18_s16 }
   0x4   :  { %p281_p1 = scmp.lt.u32.totalorder %s277_s18, %s428_s1 }
   0x6   :  { %p283_p2 = pnand %p281_p1, %p278_p0 }
   0x8   :  { %286 = shalt.err (!%p283_p2)
}
   0x9   :  { %s287_s23 = scalar_lea.vmem %s19_s16, 256  ;;  %p292_p4 = scmp.lt.s32.totalorder %s19_s16, %s19_s16 }
   0xa   :  { %p288_p3 = scmp.ne.s32.totalorder %s19_s16, %s287_s23  ;;  %p293_p5 = scmp.lt.s32.totalorder %s287_s23, %s287_s23 }
   0xc   :  { %p294_p6 = por %p293_p5, %p292_p4 }
   0xe   :  { %p295_p7 = pnand %p294_p6, %p288_p3 }
  0x10   :  { %298 = shalt.err (!%p295_p7)
}
  0x11   :  { %s350_s24 = smov 128   ;;  %s351_s25 = smov 8  }
  0x12   :  { %24 = dma.hbm_to_vmem [thread:$0]  %s428_s1, 256, %s19_s16, [#allocation6], %s350_s24, %s350_s24, %s351_s25  }
  0x13   :  { %s352_s28 = smov [#allocation8]   ;;  %s299_s6 = scalar_lea.hbm %s429_s2, 2048 }
  0x14   :  { %s30_s29 = sshll.u32 %s352_s28, 4  ;;  %p300_p8 = scmp.ne.s32.totalorder %s429_s2, %s299_s6  ;;  %s31_s29 = int_to_ptr.vmem [resolvable:$true] %s30_s29 }
  0x15   :  { %p303_p9 = scmp.lt.u32.totalorder %s299_s6, %s429_s2 }
  0x17   :  { %p305_p10 = pnand %p303_p9, %p300_p8 }
  0x19   :  { %308 = shalt.err (!%p305_p10)
}
  0x1a   :  { %s309_s11 = scalar_lea.vmem %s31_s29, 2048  ;;  %p314_p12 = scmp.lt.s32.totalorder %s31_s29, %s31_s29 }
  0x1b   :  { %p310_p11 = scmp.ne.s32.totalorder %s31_s29, %s309_s11  ;;  %p315_p13 = scmp.lt.s32.totalorder %s309_s11, %s309_s11 }
  0x1d   :  { %p316_p0 = por %p315_p13, %p314_p12 }
  0x1f   :  { %p317_p1 = pnand %p316_p0, %p310_p11 }
  0x21   :  { %320 = shalt.err (!%p317_p1)
}
  0x22   :  { %36 = dma.hbm_to_vmem [thread:$0]  %s429_s2, 2048, %s31_s29, [#allocation9], %s350_s24, %s350_s24, %s351_s25  }
  0x23   :  { %343 = dma.done.wait [#allocation6], 256  }
  0x24   :  { %344 = vsyncadd [#allocation6], 4294967040 }
  0x25   :  { %345 = dma.done.wait [#allocation9], 2048  }
  0x26   :  { %346 = vsyncadd [#allocation9], 4294965248  ;;  %v55_v0 = vld [vmem:[#allocation8] sm:$0xff]  ;;  %v56_v1 = vld [vmem:[#allocation8 + $0x8] sm:$0xff]  ;;  %s353_s14 = smov [#allocation10]  }
  0x27   :  { %v57_v2 = vld [vmem:[#allocation8 + $0x10] sm:$0xff]  ;;  %v240_v3 = vpack.c.bf16 %v56_v1, %v55_v0  ;;  %v58_v4 = vld [vmem:[#allocation8 + $0x18] sm:$0xff]  ;;  %v59_v6 = vld [vmem:[#allocation8 + $0x20] sm:$0xff]  ;;  %s173_s15 = sshll.u32 %s353_s14, 4  ;;  %s174_s15 = int_to_ptr.vmem [resolvable:$true] %s173_s15 }
  0x28   :  { %v244_v5 = vpack.c.bf16 %v58_v4, %v57_v2  ;;  %v60_v7 = vld [vmem:[#allocation8 + $0x28] sm:$0xff]  ;;  %v53_v9 = vld [vmem:[#allocation5] sm:$0xff]  ;;  %v62_v11 = vld [vmem:[#allocation8 + $0x38] sm:$0xff]  ;;  %s321_s16 = scalar_lea.vmem %s174_s15, 256  ;;  %p326_p3 = scmp.lt.s32.totalorder %s174_s15, %s174_s15 }
  0x29   :  { %241 = vmatprep.subr.bf16.mxu0 %v240_v3  ;;  %v248_v8 = vpack.c.bf16 %v60_v7, %v59_v6  ;;  %v61_v10 = vld [vmem:[#allocation8 + $0x30] sm:$0xff]  ;;  %237 = vmatprep.mubr.f32.mxu0 %v53_v9  ;;  %v63_v13 = vld [vmem:[#allocation8 + $0x40] sm:$0xff]  ;;  %v64_v14 = vld [vmem:[#allocation8 + $0x48] sm:$0xff]  ;;  %p322_p2 = scmp.ne.s32.totalorder %s174_s15, %s321_s16  ;;  %p327_p4 = scmp.lt.s32.totalorder %s321_s16, %s321_s16 }
  0x2a   :  { %243 = vmatpush3.bf16.msra.mxu0 %v240_v3  ;;  %v252_v12 = vpack.c.bf16 %v62_v11, %v61_v10  ;;  %v256_v15 = vpack.c.bf16 %v64_v14, %v63_v13  ;;  %v65_v16 = vld [vmem:[#allocation8 + $0x50] sm:$0xff]  ;;  %v66_v17 = vld [vmem:[#allocation8 + $0x58] sm:$0xff]  ;;  %v67_v19 = vld [vmem:[#allocation8 + $0x60] sm:$0xff] }
  0x2b   :  { %245 = vmatprep.subr.bf16.mxu0 %v244_v5  ;;  %v260_v18 = vpack.c.bf16 %v66_v17, %v65_v16  ;;  %v68_v20 = vld [vmem:[#allocation8 + $0x68] sm:$0xff]  ;;  %v69_v22 = vld [vmem:[#allocation8 + $0x70] sm:$0xff]  ;;  %v70_v23 = vld [vmem:[#allocation8 + $0x78] sm:$0xff]  ;;  %p328_p5 = por %p327_p4, %p326_p3 }
  0x2c   :  { %v264_v21 = vpack.c.bf16 %v68_v20, %v67_v19  ;;  %v268_v24 = vpack.c.bf16 %v70_v23, %v69_v22  ;;  %v54_v25 = vld [vmem:[#allocation5 + $0x8] sm:$0xff]  ;;  %v186_v26 = vld [vmem:[%s430_s3] ss:$0 sm:$0xff] }
  0x2d   :  { %p329_p6 = pnand %p328_p5, %p322_p2 }
  0x2e   :  { %247 = vmatpush3.bf16.msra.mxu0 %v244_v5 }
  0x2f   :  { %249 = vmatprep.subr.bf16.mxu0 %v248_v8 }
  0x32   :  { %251 = vmatpush3.bf16.msra.mxu0 %v248_v8 }
  0x33   :  { %253 = vmatprep.subr.bf16.mxu0 %v252_v12 }
  0x36   :  { %255 = vmatpush3.bf16.msra.mxu0 %v252_v12 }
  0x37   :  { %257 = vmatprep.subr.bf16.mxu0 %v256_v15 }
  0x3a   :  { %259 = vmatpush3.bf16.msra.mxu0 %v256_v15 }
  0x3b   :  { %261 = vmatprep.subr.bf16.mxu0 %v260_v18 }
  0x3e   :  { %263 = vmatpush3.bf16.msra.mxu0 %v260_v18 }
  0x3f   :  { %265 = vmatprep.subr.bf16.mxu0 %v264_v21 }
  0x42   :  { %267 = vmatpush3.bf16.msra.mxu0 %v264_v21 }
  0x43   :  { %269 = vmatprep.subr.bf16.mxu0 %v268_v24 }
  0x46   :  { %271 = vmatpush3.bf16.msra.mxu0 %v268_v24 }
  0x49   :  { %238 = vmatmul.mubr.f32.vlgmr.msra.gmra.mrb[0].mxu0 %v54_v25 }
 0x11c   :  { %v239_v27 = vpop.f32.mrb[0].mxu0 }
 0x11d   :  { %v163_v28 = vadd.f32 %v239_v27, %v186_v26  ;;  %v137_v29 = vpop.f32.mrb[1].mxu0 }
 0x11e   :  { %v162_v30 = vadd.f32 %v186_v26, %v137_v29 }
 0x11f   :  { %v165_v31 = vmax.f32 %v163_v28, 0.0 }
 0x120   :  { %v164_v32 = vmax.f32 %v162_v30, 0.0 }
 0x121   :  { %167 = vst [vmem:[#allocation10 + $0x8] sm:$0xff] %v165_v31 }
 0x122   :  { %166 = vst [vmem:[#allocation10] sm:$0xff] %v164_v32 }
 0x123   :  { %332 = shalt.err (!%p329_p6)
}
 0x124   :  { %s333_s0 = scalar_lea.hbm %s431_s4, 256 }
 0x125   :  { %p334_p7 = scmp.ne.s32.totalorder %s431_s4, %s333_s0  ;;  %p337_p8 = scmp.lt.u32.totalorder %s333_s0, %s431_s4 }
 0x127   :  { %p339_p9 = pnand %p337_p8, %p334_p7 }
 0x129   :  { %342 = shalt.err (!%p339_p9)
}
 0x12a   :  { %179 = dma.vmem_to_hbm [thread:$0]  %s174_s15, 256, %s431_s4, [#allocation7], %s350_s24, %s350_s24, %s351_s25  }
 0x12b   :  { %347 = dma.done.wait [#allocation7], 256  }
 0x12c   :  { %348 = vsyncadd [#allocation7], 4294967040 }
 0x12d   :  { %183 = vsyncpa [#allocation6], 1 }
 0x12e   :  { %184 = vsyncpa [#allocation9], 1 }
 0x12f   :  { %185 = vsyncpa [#allocation7], 1 }

</bundles_post_ra>
